<compile_context>
chip_gen: v7x
topology: tpu7x:2x2x1
jax: 0.10.0
libtpu: 0.0.40
codegen_flags: <defaults>
</compile_context>

<pallas_src>
from functools import partial

import jax
import jax.numpy as jnp
from jax.experimental import pallas as pl
from jax.experimental.pallas import tpu as pltpu


def _attention_kernel(x_ref, gamma_ref, beta_ref, w3_ref, wout3_ref,
                      out_ref, *att_refs,
                      heads, dim_head, ln_eps, compute_dtype, approx_recip):
    # x_ref block: (1, N, dim)
    N = x_ref.shape[1]
    dim = x_ref.shape[2]
    dh = dim_head

    x = x_ref[0].astype(jnp.float32)                       # (N, dim)

    # ---- LayerNorm over last dim (f32) ----
    mean = jnp.mean(x, axis=-1, keepdims=True)
    var = jnp.mean((x - mean) ** 2, axis=-1, keepdims=True)
    xn = (x - mean) * jax.lax.rsqrt(var + ln_eps)
    xn = xn * gamma_ref[...] + beta_ref[...]               # (N, dim)

    # ---- fused QKV projection, heads-batched ----
    # w3_ref: (heads, dim, 3*dh), softmax scale already folded into Q columns.
    xh = jnp.broadcast_to(xn.astype(compute_dtype), (heads, N, dim))
    qkv = jnp.einsum("hnd,hde->hne", xh, w3_ref[...],
                     preferred_element_type=jnp.float32)   # (heads, N, 3*dh) f32
    q = qkv[:, :, 0 * dh:1 * dh].astype(compute_dtype)
    k = qkv[:, :, 1 * dh:2 * dh].astype(compute_dtype)
    v = qkv[:, :, 2 * dh:3 * dh].astype(compute_dtype)

    # ---- heads-batched scaled dot-product attention (softmax in f32) ----
    s = jnp.einsum("hqd,hkd->hqk", q, k,
                   preferred_element_type=jnp.float32)     # (heads, N, N)
    s = s - jnp.max(s, axis=-1, keepdims=True)
    p = jnp.exp(s)
    p = p * pl.reciprocal(jnp.sum(p, axis=-1, keepdims=True), approx=approx_recip)

    if att_refs:                                           # only when return_att=True
        att_refs[0][0] = p.astype(att_refs[0].dtype)

    o = jnp.einsum("hqk,hkd->hqd", p.astype(compute_dtype), v,
                   preferred_element_type=jnp.float32)     # (heads, N, dh)

    # ---- fused out_proj @ to_out, heads-batched, summed over heads ----
    # wout3_ref: (heads, dh, dim)
    partial_out = jnp.einsum("hnd,hdo->hno", o.astype(compute_dtype), wout3_ref[...],
                             preferred_element_type=jnp.float32)   # (heads, N, dim)
    out_ref[0] = jnp.sum(partial_out, axis=0).astype(out_ref.dtype)


def _fuse_params(params, heads, dim_head, compute_dtype):
    """Exact offline fusion of the bias-free linear chains (done once in the wrapper)."""
    inner = heads * dim_head
    dim = params["w_out"].shape[1]
    wqkv = params["w_qkv"]                                  # (dim, 3*inner)
    scale = 1.0 / jnp.sqrt(jnp.float32(dim_head))

    q_eff = (wqkv[:, 0 * inner:1 * inner] @ params["w_q"]) * scale   # (dim, inner)
    k_eff = wqkv[:, 1 * inner:2 * inner] @ params["w_k"]
    v_eff = wqkv[:, 2 * inner:3 * inner] @ params["w_v"]

    def to_heads(m):                                        # (dim, inner) -> (heads, dim, dh)
        return m.reshape(dim, heads, dim_head).transpose(1, 0, 2)

    w3 = jnp.concatenate([to_heads(q_eff), to_heads(k_eff), to_heads(v_eff)],
                         axis=-1)                           # (heads, dim, 3*dh)
    wout_eff = params["w_oproj"] @ params["w_out"]          # (inner, dim)
    wout3 = wout_eff.reshape(heads, dim_head, dim)          # (heads, dh, dim)
    return w3.astype(compute_dtype), wout3.astype(compute_dtype)


def attention_forward(x, params, *, heads, dim_head, ln_eps=1e-5,
                      return_att=False, compute_dtype=jnp.float32,
                      approx_softmax_recip=False):
    """x: (B, N, dim) float32 -> (out (B, N, dim), att (B, heads, N, N) | None)."""
    B, N, dim = x.shape

    gamma = params["ln_gamma"].reshape(1, dim).astype(jnp.float32)
    beta = params["ln_beta"].reshape(1, dim).astype(jnp.float32)
    w3, wout3 = _fuse_params(params, heads, dim_head, compute_dtype)

    kernel = partial(_attention_kernel, heads=heads, dim_head=dim_head,
                     ln_eps=ln_eps, compute_dtype=compute_dtype,
                     approx_recip=approx_softmax_recip)

    in_specs = [
        pl.BlockSpec((1, N, dim), lambda b: (b, 0, 0)),                 # x
        pl.BlockSpec((1, dim), lambda b: (0, 0)),                       # gamma
        pl.BlockSpec((1, dim), lambda b: (0, 0)),                       # beta
        pl.BlockSpec((heads, dim, 3 * dim_head), lambda b: (0, 0, 0)),  # fused QKV W
        pl.BlockSpec((heads, dim_head, dim), lambda b: (0, 0, 0)),      # fused out W
    ]
    out_spec_main = pl.BlockSpec((1, N, dim), lambda b: (b, 0, 0))

    if return_att:
        out_shape = (jax.ShapeDtypeStruct((B, N, dim), x.dtype),
                     jax.ShapeDtypeStruct((B, heads, N, N), jnp.float32))
        out_specs = [out_spec_main,
                     pl.BlockSpec((1, heads, N, N), lambda b: (b, 0, 0, 0))]
    else:
        out_shape = jax.ShapeDtypeStruct((B, N, dim), x.dtype)
        out_specs = out_spec_main

    # VMEM budget derived from the actual block footprint (x/out/att blocks +
    # weights), with headroom; clamped to stay within every chip's physical VMEM.
    itemsize_c = jnp.dtype(compute_dtype).itemsize
    block_bytes = (2 * N * dim * 4
                   + (heads * N * N * 4 if return_att else 0)
                   + heads * dim * 3 * dim_head * itemsize_c
                   + heads * dim_head * dim * itemsize_c
                   + 2 * dim * 4)
    vmem_limit = int(min(64 * 2 ** 20, max(32 * 2 ** 20, 6 * block_bytes)))

    result = pl.pallas_call(
        kernel,
        out_shape=out_shape,
        grid_spec=pltpu.PrefetchScalarGridSpec(
            num_scalar_prefetch=0,
            grid=(B,),
            in_specs=in_specs,
            out_specs=out_specs,
        ),
        compiler_params=pltpu.CompilerParams(
            dimension_semantics=("parallel",),
            vmem_limit_bytes=vmem_limit),
    )(x, gamma, beta, w3, wout3)

    if return_att:
        out, att = result
        return out, att
    return result, None


def init_params(key, dim, heads, dim_head):
    inner = heads * dim_head
    ks = jax.random.split(key, 6)
    s = 0.05
    return {
        "ln_gamma": jnp.ones((dim,), jnp.float32),
        "ln_beta": jnp.zeros((dim,), jnp.float32),
        # stored already transposed for right-multiplication:
        "w_qkv": s * jax.random.normal(ks[0], (dim, 3 * inner), jnp.float32),
        "w_q": s * jax.random.normal(ks[1], (inner, inner), jnp.float32),
        "w_k": s * jax.random.normal(ks[2], (inner, inner), jnp.float32),
        "w_v": s * jax.random.normal(ks[3], (inner, inner), jnp.float32),
        "w_oproj": s * jax.random.normal(ks[4], (inner, inner), jnp.float32),
        "w_out": s * jax.random.normal(ks[5], (inner, dim), jnp.float32),
    }


def _reference(x, params, heads, dim_head, ln_eps=1e-5):
    """Pure-JAX reference mirroring the (unfused) PyTorch forward semantics."""
    inner = heads * dim_head
    mean = jnp.mean(x, -1, keepdims=True)
    var = jnp.mean((x - mean) ** 2, -1, keepdims=True)
    xn = (x - mean) / jnp.sqrt(var + ln_eps) * params["ln_gamma"] + params["ln_beta"]
    qkv = xn @ params["w_qkv"]
    q, k, v = jnp.split(qkv, 3, axis=-1)
    q = q @ params["w_q"]
    k = k @ params["w_k"]
    v = v @ params["w_v"]
    B, N, _ = x.shape
    qh = q.reshape(B, N, heads, dim_head).transpose(0, 2, 1, 3)
    kh = k.reshape(B, N, heads, dim_head).transpose(0, 2, 1, 3)
    vh = v.reshape(B, N, heads, dim_head).transpose(0, 2, 1, 3)
    s = jnp.einsum("bhqd,bhkd->bhqk", qh, kh) / jnp.sqrt(jnp.float32(dim_head))
    att = jax.nn.softmax(s, axis=-1)
    o = jnp.einsum("bhqk,bhkd->bhqd", att, vh).transpose(0, 2, 1, 3).reshape(B, N, inner)
    o = o @ params["w_oproj"]
    return o @ params["w_out"], att


if __name__ == "__main__":
    B, N, dim = 2, 8, 32
    heads, dim_head = 4, 8

    key = jax.random.PRNGKey(0)
    kx, kp = jax.random.split(key)
    x = jax.random.normal(kx, (B, N, dim), jnp.float32)
    params = init_params(kp, dim, heads, dim_head)

    ref_out, ref_att = _reference(x, params, heads, dim_head)

    # Exact path: f32 MXU operands, exact softmax reciprocal, att weights emitted.
    out, att = attention_forward(x, params, heads=heads, dim_head=dim_head,
                                 return_att=True,
                                 compute_dtype=jnp.float32,
                                 approx_softmax_recip=False)
    out = jax.block_until_ready(out)
    att = jax.block_until_ready(att)
    assert out.shape == (B, N, dim) and att.shape == (B, heads, N, N)
    assert jnp.allclose(out, ref_out, atol=1e-4, rtol=1e-4)
    assert jnp.allclose(att, ref_att, atol=1e-4, rtol=1e-4)

    # Fast path: bf16 MXU operands / f32 accumulation, EUP approx reciprocal,
    # no attention-weights output (no big HBM writeback, smaller VMEM block).
    out_fast, att_none = attention_forward(x, params, heads=heads, dim_head=dim_head,
                                           return_att=False,
                                           compute_dtype=jnp.bfloat16,
                                           approx_softmax_recip=True)
    out_fast = jax.block_until_ready(out_fast)
    assert att_none is None
    assert out_fast.shape == (B, N, dim)
    assert jnp.allclose(out_fast, ref_out, atol=5e-2, rtol=5e-2)

    print("KERNEL_OK")
</pallas_src>

<mosaic_0001>
module attributes {stable_mosaic.version = 11 : i64} {
  func.func @_attention_kernel(%arg0: i32, %arg1: memref<1x8x32xf32, #tpu.memory_space<vmem>>, %arg2: memref<1x32xf32, #tpu.memory_space<vmem>>, %arg3: memref<1x32xf32, #tpu.memory_space<vmem>>, %arg4: memref<4x32x24xf32, #tpu.memory_space<vmem>>, %arg5: memref<4x8x32xf32, #tpu.memory_space<vmem>>, %arg6: memref<1x8x32xf32, #tpu.memory_space<vmem>>, %arg7: memref<1x4x8x8xf32, #tpu.memory_space<vmem>>) attributes {dimension_semantics = [#tpu.dimension_semantics<parallel>], iteration_bounds = array<i64: 2>, scalar_prefetch = 0 : i64, scratch_operands = 0 : i64, tpu.core_type = #tpu.core_type<tc>, window_params = [{transform_indices = @transform_0, window_bounds = array<i64: 1, 8, 32>}, {pipeline_mode = #tpu.pipeline_mode<synchronous>, transform_indices = @transform_1, window_bounds = array<i64: 1, 32>}, {pipeline_mode = #tpu.pipeline_mode<synchronous>, transform_indices = @transform_2, window_bounds = array<i64: 1, 32>}, {pipeline_mode = #tpu.pipeline_mode<synchronous>, transform_indices = @transform_3, window_bounds = array<i64: 4, 32, 24>}, {pipeline_mode = #tpu.pipeline_mode<synchronous>, transform_indices = @transform_4, window_bounds = array<i64: 4, 8, 32>}, {transform_indices = @transform_5, window_bounds = array<i64: 1, 8, 32>}, {transform_indices = @transform_6, window_bounds = array<i64: 1, 4, 8, 8>}]} {
    %c0 = arith.constant 0 : index
    %c0_0 = arith.constant 0 : index
    %c0_1 = arith.constant 0 : index
    %0 = vector.load %arg1[%c0, %c0_0, %c0_1] : memref<1x8x32xf32, #tpu.memory_space<vmem>>, vector<1x8x32xf32>
    %1 = vector.shape_cast %0 : vector<1x8x32xf32> to vector<8x32xf32>
    %cst = arith.constant dense<0.000000e+00> : vector<8xf32>
    %2 = vector.multi_reduction <add>, %1, %cst [1] : vector<8x32xf32> to vector<8xf32>
    %3 = vector.shape_cast %2 : vector<8xf32> to vector<8x1xf32>
    %cst_2 = arith.constant 3.200000e+01 : f32
    %4 = vector.broadcast %cst_2 : f32 to vector<8x1xf32>
    %5 = arith.divf %3, %4 : vector<8x1xf32>
    %6 = vector.broadcast %5 : vector<8x1xf32> to vector<8x32xf32>
    %7 = arith.subf %1, %6 : vector<8x32xf32>
    %8 = arith.mulf %7, %7 : vector<8x32xf32>
    %cst_3 = arith.constant dense<0.000000e+00> : vector<8xf32>
    %9 = vector.multi_reduction <add>, %8, %cst_3 [1] : vector<8x32xf32> to vector<8xf32>
    %10 = vector.shape_cast %9 : vector<8xf32> to vector<8x1xf32>
    %cst_4 = arith.constant 3.200000e+01 : f32
    %11 = vector.broadcast %cst_4 : f32 to vector<8x1xf32>
    %12 = arith.divf %10, %11 : vector<8x1xf32>
    %13 = vector.broadcast %5 : vector<8x1xf32> to vector<8x32xf32>
    %14 = arith.subf %1, %13 : vector<8x32xf32>
    %cst_5 = arith.constant 9.99999974E-6 : f32
    %15 = vector.broadcast %cst_5 : f32 to vector<8x1xf32>
    %16 = arith.addf %12, %15 : vector<8x1xf32>
    %17 = math.rsqrt %16 : vector<8x1xf32>
    %18 = vector.broadcast %17 : vector<8x1xf32> to vector<8x32xf32>
    %19 = arith.mulf %14, %18 : vector<8x32xf32>
    %c0_6 = arith.constant 0 : index
    %c0_7 = arith.constant 0 : index
    %20 = vector.load %arg2[%c0_6, %c0_7] : memref<1x32xf32, #tpu.memory_space<vmem>>, vector<1x32xf32>
    %21 = vector.broadcast %20 : vector<1x32xf32> to vector<8x32xf32>
    %22 = arith.mulf %19, %21 : vector<8x32xf32>
    %c0_8 = arith.constant 0 : index
    %c0_9 = arith.constant 0 : index
    %23 = vector.load %arg3[%c0_8, %c0_9] : memref<1x32xf32, #tpu.memory_space<vmem>>, vector<1x32xf32>
    %24 = vector.broadcast %23 : vector<1x32xf32> to vector<8x32xf32>
    %25 = arith.addf %22, %24 : vector<8x32xf32>
    %26 = vector.shape_cast %25 : vector<8x32xf32> to vector<1x8x32xf32>
    %27 = vector.broadcast %26 : vector<1x8x32xf32> to vector<4x8x32xf32>
    %c0_10 = arith.constant 0 : index
    %c0_11 = arith.constant 0 : index
    %c0_12 = arith.constant 0 : index
    %28 = vector.load %arg4[%c0_10, %c0_11, %c0_12] : memref<4x32x24xf32, #tpu.memory_space<vmem>>, vector<4x32x24xf32>
    "tpu.trace_start"() <{level = 10 : i32, message = "hnd,hde->hne"}> : () -> ()
    %cst_13 = arith.constant dense<0.000000e+00> : vector<4x8x24xf32>
    %29 = tpu.matmul %27, %28, %cst_13 {dimension_numbers = #tpu.dot_dimension_numbers<[2], [1], [1], [2], [0, 0, 0, 1, 1, 2], [0], [0]>} : vector<4x8x32xf32>, vector<4x32x24xf32>, vector<4x8x24xf32> -> vector<4x8x24xf32>
    "tpu.trace_stop"() : () -> ()
    %30 = vector.extract_strided_slice %29 {offsets = [0, 0, 0], sizes = [4, 8, 8], strides = [1, 1, 1]} : vector<4x8x24xf32> to vector<4x8x8xf32>
    %31 = vector.extract_strided_slice %29 {offsets = [0, 0, 8], sizes = [4, 8, 8], strides = [1, 1, 1]} : vector<4x8x24xf32> to vector<4x8x8xf32>
    %32 = vector.extract_strided_slice %29 {offsets = [0, 0, 16], sizes = [4, 8, 8], strides = [1, 1, 1]} : vector<4x8x24xf32> to vector<4x8x8xf32>
    "tpu.trace_start"() <{level = 10 : i32, message = "hqd,hkd->hqk"}> : () -> ()
    %cst_14 = arith.constant dense<0.000000e+00> : vector<4x8x8xf32>
    %33 = tpu.matmul %30, %31, %cst_14 {dimension_numbers = #tpu.dot_dimension_numbers<[2], [2], [1], [1], [0, 0, 0, 1, 1, 1], [0], [0]>} : vector<4x8x8xf32>, vector<4x8x8xf32>, vector<4x8x8xf32> -> vector<4x8x8xf32>
    "tpu.trace_stop"() : () -> ()
    %cst_15 = arith.constant dense<0xFF800000> : vector<4x8xf32>
    %34 = vector.multi_reduction <maximumf>, %33, %cst_15 [2] : vector<4x8x8xf32> to vector<4x8xf32>
    %35 = vector.shape_cast %34 : vector<4x8xf32> to vector<4x8x1xf32>
    %36 = vector.broadcast %35 : vector<4x8x1xf32> to vector<4x8x8xf32>
    %37 = arith.subf %33, %36 : vector<4x8x8xf32>
    %38 = math.exp %37 : vector<4x8x8xf32>
    %cst_16 = arith.constant dense<0.000000e+00> : vector<4x8xf32>
    %39 = vector.multi_reduction <add>, %38, %cst_16 [2] : vector<4x8x8xf32> to vector<4x8xf32>
    %40 = vector.shape_cast %39 : vector<4x8xf32> to vector<4x8x1xf32>
    %41 = tpu.reciprocal %40 : vector<4x8x1xf32> -> vector<4x8x1xf32>
    %42 = vector.broadcast %41 : vector<4x8x1xf32> to vector<4x8x8xf32>
    %43 = arith.mulf %38, %42 : vector<4x8x8xf32>
    %c0_17 = arith.constant 0 : index
    %c0_18 = arith.constant 0 : index
    %c0_19 = arith.constant 0 : index
    %c0_20 = arith.constant 0 : index
    %44 = vector.load %arg7[%c0_17, %c0_18, %c0_19, %c0_20] : memref<1x4x8x8xf32, #tpu.memory_space<vmem>>, vector<1x4x8x8xf32>
    %45 = vector.shape_cast %44 : vector<1x4x8x8xf32> to vector<4x8x8xf32>
    %46 = vector.shape_cast %43 : vector<4x8x8xf32> to vector<1x4x8x8xf32>
    tpu.vector_store %arg7[%c0_17, %c0_18, %c0_19, %c0_20], %46 {strides = array<i32>} : memref<1x4x8x8xf32, #tpu.memory_space<vmem>>, vector<1x4x8x8xf32>,
    "tpu.trace_start"() <{level = 10 : i32, message = "hqk,hkd->hqd"}> : () -> ()
    %cst_21 = arith.constant dense<0.000000e+00> : vector<4x8x8xf32>
    %47 = tpu.matmul %43, %32, %cst_21 {dimension_numbers = #tpu.dot_dimension_numbers<[2], [1], [1], [2], [0, 0, 0, 1, 1, 2], [0], [0]>} : vector<4x8x8xf32>, vector<4x8x8xf32>, vector<4x8x8xf32> -> vector<4x8x8xf32>
    "tpu.trace_stop"() : () -> ()
    %c0_22 = arith.constant 0 : index
    %c0_23 = arith.constant 0 : index
    %c0_24 = arith.constant 0 : index
    %48 = vector.load %arg5[%c0_22, %c0_23, %c0_24] : memref<4x8x32xf32, #tpu.memory_space<vmem>>, vector<4x8x32xf32>
    "tpu.trace_start"() <{level = 10 : i32, message = "hnd,hdo->hno"}> : () -> ()
    %cst_25 = arith.constant dense<0.000000e+00> : vector<4x8x32xf32>
    %49 = tpu.matmul %47, %48, %cst_25 {dimension_numbers = #tpu.dot_dimension_numbers<[2], [1], [1], [2], [0, 0, 0, 1, 1, 2], [0], [0]>} : vector<4x8x8xf32>, vector<4x8x32xf32>, vector<4x8x32xf32> -> vector<4x8x32xf32>
    "tpu.trace_stop"() : () -> ()
    %cst_26 = arith.constant dense<0.000000e+00> : vector<8x32xf32>
    %50 = vector.multi_reduction <add>, %49, %cst_26 [0] : vector<4x8x32xf32> to vector<8x32xf32>
    %c0_27 = arith.constant 0 : index
    %c0_28 = arith.constant 0 : index
    %c0_29 = arith.constant 0 : index
    %51 = vector.load %arg6[%c0_27, %c0_28, %c0_29] : memref<1x8x32xf32, #tpu.memory_space<vmem>>, vector<1x8x32xf32>
    %52 = vector.shape_cast %51 : vector<1x8x32xf32> to vector<8x32xf32>
    %53 = vector.shape_cast %50 : vector<8x32xf32> to vector<1x8x32xf32>
    tpu.vector_store %arg6[%c0_27, %c0_28, %c0_29], %53 {strides = array<i32>} : memref<1x8x32xf32, #tpu.memory_space<vmem>>, vector<1x8x32xf32>,
    return
  }
  func.func @transform_0(%arg0: i32) -> (i32, i32, i32) {
    %c0_i32 = arith.constant 0 : i32
    %c0_i32_0 = arith.constant 0 : i32
    %c0_i32_1 = arith.constant 0 : i32
    return %arg0, %c0_i32, %c0_i32_0 : i32, i32, i32
  }
  func.func @transform_1(%arg0: i32) -> (i32, i32) {
    %c0_i32 = arith.constant 0 : i32
    %c0_i32_0 = arith.constant 0 : i32
    %c0_i32_1 = arith.constant 0 : i32
    return %c0_i32, %c0_i32_0 : i32, i32
  }
  func.func @transform_2(%arg0: i32) -> (i32, i32) {
    %c0_i32 = arith.constant 0 : i32
    %c0_i32_0 = arith.constant 0 : i32
    %c0_i32_1 = arith.constant 0 : i32
    return %c0_i32, %c0_i32_0 : i32, i32
  }
  func.func @transform_3(%arg0: i32) -> (i32, i32, i32) {
    %c0_i32 = arith.constant 0 : i32
    %c0_i32_0 = arith.constant 0 : i32
    %c0_i32_1 = arith.constant 0 : i32
    %c0_i32_2 = arith.constant 0 : i32
    return %c0_i32, %c0_i32_0, %c0_i32_1 : i32, i32, i32
  }
  func.func @transform_4(%arg0: i32) -> (i32, i32, i32) {
    %c0_i32 = arith.constant 0 : i32
    %c0_i32_0 = arith.constant 0 : i32
    %c0_i32_1 = arith.constant 0 : i32
    %c0_i32_2 = arith.constant 0 : i32
    return %c0_i32, %c0_i32_0, %c0_i32_1 : i32, i32, i32
  }
  func.func @transform_5(%arg0: i32) -> (i32, i32, i32) {
    %c0_i32 = arith.constant 0 : i32
    %c0_i32_0 = arith.constant 0 : i32
    %c0_i32_1 = arith.constant 0 : i32
    return %arg0, %c0_i32, %c0_i32_0 : i32, i32, i32
  }
  func.func @transform_6(%arg0: i32) -> (i32, i32, i32, i32) {
    %c0_i32 = arith.constant 0 : i32
    %c0_i32_0 = arith.constant 0 : i32
    %c0_i32_1 = arith.constant 0 : i32
    %c0_i32_2 = arith.constant 0 : i32
    return %arg0, %c0_i32, %c0_i32_0, %c0_i32_1 : i32, i32, i32, i32
  }
}

</mosaic_0001>

<bundles_post_ra>
// kernel: tpu_custom_call.1
= control target key start
LH: loop header
LB: loop body
LE: loop exit
PB: predicated region body
PF: predicated region fallthrough
CT: control target
= control target key end

     0   :  { %12 = vsyncpa [#allocation3], 0  ;;  %s2405_s0 = inlined_call_operand.vmem [shape: f32[2,8,32], index: 0, kind: input, shape index: {}]   ;;  %s2406_s1 = inlined_call_operand.vmem [shape: f32[1,32], index: 1, kind: input, shape index: {}]   ;;  %s2407_s2 = inlined_call_operand.vmem [shape: f32[1,32], index: 2, kind: input, shape index: {}]   ;;  %s2408_s3 = inlined_call_operand.vmem [shape: f32[4,32,24], index: 3, kind: input, shape index: {}]   ;;  %s2409_s4 = inlined_call_operand.vmem [shape: f32[4,8,32], index: 4, kind: input, shape index: {}]   ;;  %s2410_s5 = inlined_call_operand.hbm [shape: f32[2,8,32], index: 5, kind: output, shape index: {0}]   ;;  %s2411_s6 = inlined_call_operand.hbm [shape: f32[2,4,8,8], index: 6, kind: output, shape index: {1}]  }
   0x1   :  { %14 = vsyncpa [#allocation3 + $0x1], 0 }
   0x2   :  { %15 = vsyncpa [#allocation5], 0 }
   0x3   :  { %17 = vsyncpa [#allocation5 + $0x1], 0  ;;  %s2098_s21 = smov 0   ;;  %s2100_s22 = smov 0  }
   0x4   :  { %s2102_s23 = smov 0   ;;  %s2104_s24 = smov 0  }
   0x5 LB: > { %s2119_s25 = sadd.s32 4294967295, %s2052_s24   ;;  %s1680_s26 = sadd.s32 4294967294, %s2052_s24   ;;  %s2052_s24 = sphi %s2104_s24, %s2417_s24   ;;  %s2048_s23 = sphi %s2102_s23, %s2416_s23   ;;  %s2044_s22 = sphi %s2100_s22, %s2415_s22   ;;  %s2040_s21 = sphi %s2098_s21, %s2414_s21  }
   0x6   : > { %s2123_s27 = sadd.s32 1, %s2052_s24   ;;  %s140_s28 = sadd.s32 1, %s2048_s23 }
   0x7   : > { %s137_s29 = ssub.s32 %s2052_s24, %s2123_s27  ;;  %p150_p0 = scmp.ne.s32.totalorder %s2048_s23, %s2044_s22 }
   0x8   : > { %p138_p1 = scmp.eq.s32.totalorder %s137_s29, 0  ;;  %p151_p2 = scmp.eq.s32.totalorder %s2119_s25, 1 }
   0x9   : > { %p156_p3 = scmp.ne.s32.totalorder %s2044_s22, %s2040_s21  ;;  %p157_p4 = scmp.eq.s32.totalorder %s1680_s26, 1 }
   0xa   : > { %s2134_s30 = scalar_select %p138_p1, %s2048_s23, %s140_s28  }
   0xb   : > { %p2136_p5 = por %p151_p2, %p150_p0  ;;  %p2140_p6 = por %p157_p4, %p156_p3 }
   0xc   : > { %p1683_p7 = scmp.ge.s32.totalorder %s2052_s24, 1  ;;  %p220_p8 = scmp.lt.s32.totalorder %s2052_s24, 3 }
   0xe   : > { %p221_p9 = pnand %p1683_p7, %p220_p8 }
   0xf   : > { %p254_p10 = scmp.lt.s32.totalorder (!%p221_p9), %s2119_s25, 1  ;;  %vm259_vm0 = vcmask (!%p221_p9), 261120   ;;  %v290_v7 = vld [vmem:[%s2408_s3] sm:$0xff] (!%p221_p9)  ;;  %v291_v8 = vld [vmem:[%s2408_s3 + $0x8] sm:$0xff] (!%p221_p9)  ;;  %v2054_v10 = vmov (!%p221_p9), 0.0|0.0   ;;  %v292_v13 = vld [vmem:[%s2408_s3 + $0x10] sm:$0xff] (!%p221_p9) }
  0x10   : > { %224 = sbr.rel (%p221_p9) target bundleno = 1650 (0x672), region = 40  ;;  %v294_v9 = vld [vmem:[%s2408_s3 + $0x20] sm:$0xff] (!%p221_p9)  ;;  %1865 = vmatprep.subr.bf16.mxu0 (!%p221_p9), %v2054_v10  ;;  %1871 = vmatprep.subr.bf16.mxu1 (!%p221_p9), %v2054_v10  ;;  %v1866_v11 = vpack.c.bf16 (!%p221_p9), %v291_v8, %v290_v7  ;;  %v295_v12 = vld [vmem:[%s2408_s3 + $0x28] sm:$0xff] (!%p221_p9)  ;;  %v293_v14 = vld [vmem:[%s2408_s3 + $0x18] sm:$0xff] (!%p221_p9)  ;;  %vm2055_vm1 = vmmov (!%p221_p9), 0   ;;  %v2056_v18 = vmov (!%p221_p9), 0.0  }
  0x11   : > { %v1872_v15 = vpack.c.bf16 (!%p221_p9), %v295_v12, %v294_v9  ;;  %v296_v16 = vld [vmem:[%s2408_s3 + $0x30] sm:$0xff] (!%p221_p9)  ;;  %v297_v17 = vld [vmem:[%s2408_s3 + $0x38] sm:$0xff] (!%p221_p9)  ;;  %1769 = vmatprep.mubr.msk.f32.mxu0 (!%p221_p9), %vm2055_vm1, %v2056_v18  ;;  %1780 = vmatprep.mubr.msk.f32.mxu1 (!%p221_p9), %vm2055_vm1, %v2056_v18  ;;  %v1869_v19 = vpack.c.bf16 (!%p221_p9), %v293_v14, %v292_v13  ;;  %v1687_v25 = vld [vmem:[%s2406_s1] ss:$0 sm:$0xff] (!%p221_p9)  ;;  %s2057_s20 = smov (!%p221_p9), 120   ;;  %vm592_vm2 = vcmask (!%p221_p9), 64512  }
  0x12   : > { %1867 = vmatpush3.bf16.msra.mxu0 (!%p221_p9), %v1866_v11  ;;  %v1875_v20 = vpack.c.bf16 (!%p221_p9), %v297_v17, %v296_v16  ;;  %v298_v26 = vld [vmem:[%s2408_s3 + $0x40] sm:$0xff] (!%p221_p9)  ;;  %v299_v28 = vld [vmem:[%s2408_s3 + $0x48] sm:$0xff] (!%p221_p9)  ;;  %v300_v35 = vld [vmem:[%s2408_s3 + $0x50] sm:$0xff] (!%p221_p9)  ;;  %s2058_s26 = smov (!%p221_p9), 112   ;;  %s2270_s28 = sand.u32 (!%p221_p9), 1, %s2044_s22  }
  0x13   : > { %1873 = vmatpush3.bf16.msra.mxu1 (!%p221_p9), %v1872_v15  ;;  %1868 = vmatprep.subr.bf16.mxu0 (!%p221_p9), %v2054_v10  ;;  %v302_v29 = vld [vmem:[%s2408_s3 + $0x60] sm:$0xff] (!%p221_p9)  ;;  %v303_v30 = vld [vmem:[%s2408_s3 + $0x68] sm:$0xff] (!%p221_p9)  ;;  %v1878_v33 = vpack.c.bf16 (!%p221_p9), %v299_v28, %v298_v26  ;;  %v301_v37 = vld [vmem:[%s2408_s3 + $0x58] sm:$0xff] (!%p221_p9)  ;;  %s1685_s29 = sshll.u32 (!%p221_p9), %s2270_s28, 5  ;;  %s1716_s19 = sshll.u32 (!%p221_p9), %s2119_s25, 9 }
  0x14   : > { %1874 = vmatprep.subr.bf16.mxu1 (!%p221_p9), %v2054_v10  ;;  %v1688_v31 = vld [vmem:[%s2407_s2] ss:$0 sm:$0xff] (!%p221_p9)  ;;  %v1884_v34 = vpack.c.bf16 (!%p221_p9), %v303_v30, %v302_v29  ;;  %v304_v38 = vld [vmem:[%s2408_s3 + $0x70] sm:$0xff] (!%p221_p9)  ;;  %v305_v39 = vld [vmem:[%s2408_s3 + $0x78] sm:$0xff] (!%p221_p9)  ;;  %v1881_v40 = vpack.c.bf16 (!%p221_p9), %v301_v37, %v300_v35  ;;  %s2059_s12 = smov (!%p221_p9), [#allocation4]  }
  0x15   : > { %v1887_v41 = vpack.c.bf16 (!%p221_p9), %v305_v39, %v304_v38  ;;  %v1250_v39 = vld [vmem:[%s2409_s4] sm:$0xff] (!%p221_p9) }
  0x16   : > { %1870 = vmatpush3.bf16.msra.mxu0 (!%p221_p9), %v1869_v19 }
  0x17   : > { %s255_s9 = scalar_select %p254_p10, %s2119_s25, 1  ;;  %1876 = vmatpush3.bf16.msra.mxu1 %v1875_v20  ;;  %1877 = vmatprep.subr.bf16.mxu0 %v2054_v10 }
  0x18   : > { %1883 = vmatprep.subr.bf16.mxu1 %v2054_v10 }
  0x19   : > { %s1686_s10 = sshll.u32 %s255_s9, 3  ;;  %s2274_s9 = scalar_lea.vmem [#allocation4], %s1685_s29 }
  0x1a   : > { %s257_s13 = scalar_lea.vmem %s2405_s0, %s1686_s10  ;;  %s1586_s18 = sshll.u32 %s2274_s9, 4  ;;  %s2321_s18 = int_to_ptr.vmem [resolvable:$true] %s1586_s18 }
  0x1b   : > { %v258_v0 = vld [vmem:[%s257_s13] sm:$0xff]  ;;  %s2326_s29 = scalar_lea.hbm %s2411_s6, %s1716_s19  ;;  %s1560_s10 = scalar_lea.sflag [#allocation5], %s2270_s28 }
  0x1c   : > { %v260_v1 = vsel %vm259_vm0, %v258_v0, 0.0  ;;  %s1958_s11 = scalar_lea.vmem %s2321_s18, 512  ;;  %s1962_s13 = sshll.u32 %s2059_s12, 4  ;;  %s1963_s13 = int_to_ptr.vmem [resolvable:$false] %s1962_s13 }
  0x1d   : > { %261 = vadd.xlane.f32.xlu0 %v260_v1  ;;  %p1959_p11 = scmp.ne.s32.totalorder %s2321_s18, %s1958_s11  ;;  %p1965_p0 = scmp.lt.s32.totalorder %s2321_s18, %s1963_s13 }
  0x1f   : > { %p1960_p12 = pnand %p1959_p11, %p2136_p5 }
  0x21   : > { %p1961_p13 = pneg %p1960_p12 }
  0xaa   : > { %v262_v2 = vpop.xlane.xlu0 %261 }
  0xab   : > { %v264_v3 = vmul.f32 0.03125, %v262_v2 }
  0xad   : > { %v265_v4 = vsub.f32 %v258_v0, %v264_v3 }
  0xaf   : > { %v266_v5 = vmul.f32 %v265_v4, %v265_v4 }
  0xb1   : > { %v267_v6 = vsel %vm259_vm0, %v266_v5, 0.0 }
  0xb2   : > { %268 = vadd.xlane.f32.xlu0 %v267_v6 }
 0x13f   : > { %v269_v21 = vpop.xlane.xlu0 %268 }
 0x140   : > { %v270_v22 = vmul.f32 0.03125, %v269_v21 }
 0x142   : > { %v271_v23 = vadd.f32 1e-05, %v270_v22 }
 0x144   : > { %1940 = vrsqrt.f32 %v271_v23 }
 0x14e   : > { %v1941_v24 = vpop.eup %1940 }
 0x14f   : > { %v273_v27 = vmul.f32 %v1941_v24, %v265_v4 }
 0x151   : > { %v281_v32 = vmul.f32 %v1687_v25, %v273_v27 }
 0x153   : > { %v289_v36 = vadd.f32 %v1688_v31, %v281_v32 }
 0x155   : > { %1770 = vmatmul.mubr.msk.f32.vlgmr.msra.gmra.mrb[0].mxu0 %vm259_vm0, %v289_v36  ;;  %1781 = vmatmul.mubr.msk.f32.vlgmr.msra.gmra.mrb[0].mxu1 %vm259_vm0, %v289_v36 }
 0x156   : > { %1879 = vmatpush3.bf16.msra.mxu0 %v1878_v33  ;;  %1885 = vmatpush3.bf16.msra.mxu1 %v1884_v34 }
 0x157   : > { %1880 = vmatprep.subr.bf16.mxu0 %v2054_v10  ;;  %1886 = vmatprep.subr.bf16.mxu1 %v2054_v10 }
 0x158   : > { %1791 = vmatprep.mubr.msk.f32.mxu0 %vm2055_vm1, %v2056_v18  ;;  %1802 = vmatprep.mubr.msk.f32.mxu1 %vm2055_vm1, %v2056_v18 }
 0x15a   : > { %1882 = vmatpush3.bf16.msra.mxu0 %v1881_v40  ;;  %1888 = vmatpush3.bf16.msra.mxu1 %v1887_v41  ;;  %v1251_v40 = vld [vmem:[%s2409_s4 + $0x8] sm:$0xff]  ;;  %v1252_v41 = vld [vmem:[%s2409_s4 + $0x10] sm:$0xff] }
 0x15b   : > { %1805 = vmatprep.subr.mxu0 %v2056_v18  ;;  %1810 = vmatprep.subr.mxu1 %v2056_v18 }
 0x15d   : > { %1792 = vmatmul.mubr.msk.f32.vlgmr.msra.gmra.mrb[2].mxu0 %vm259_vm0, %v289_v36  ;;  %1803 = vmatmul.mubr.msk.f32.vlgmr.msra.gmra.mrb[2].mxu1 %vm259_vm0, %v289_v36 }
 0x15e   : > { %1807 = vmatprep.mubr.msk.f32.mxu0 %vm2055_vm1, %v2056_v18  ;;  %1812 = vmatprep.mubr.msk.f32.mxu1 %vm2055_vm1, %v2056_v18 }
 0x228   : > { %v375_v42 = vpop.f32.mrb[0].mxu0  ;;  %v445_v43 = vpop.f32.mrb[0].mxu1 }
 0x229   : > { %v1782_v44 = vpop.f32.mrb[1].mxu1  ;;  %590 = vrot.lane.b32.xlu1 %v375_v42, %s2057_s20  ;;  %v1771_v45 = vpop.f32.mrb[1].mxu0 }
 0x22a   : > { %v1253_v44 = vld [vmem:[%s2409_s4 + $0x18] sm:$0xff] }
 0x22d   : > { %668 = vrot.lane.b32.xlu1 %v445_v43, %s2057_s20 }
 0x230   : > { %v2225_v46 = vpop.f32.mrb[2].mxu0  ;;  %v2227_v47 = vpop.f32.mrb[2].mxu1 }
 0x231   : > { %v1804_v48 = vpop.f32.mrb[3].mxu1  ;;  %745 = vrot.lane.b32.xlu0 %v2225_v46, %s2057_s20  ;;  %v1793_v49 = vpop.f32.mrb[3].mxu0  ;;  %822 = vrot.lane.b32.xlu1 %v2227_v47, %s2057_s20 }
 0x29b   : > { %v591_v50 = vpop.permute.xlu1 %590 }
 0x29c   : > { %1806 = vmatpush3.xpose.msk.msra.mxu0 %vm592_vm2, %v591_v50 }
 0x29d   : > { %1815 = vmatprep.subr.mxu0 %v2056_v18 }
 0x29f   : > { %1808 = vmatmul.mubr.msk.f32.vlgmr.msra.gmra.mrb[4].mxu0 %vm592_vm2, %v375_v42  ;;  %v669_v51 = vpop.permute.xlu1 %668 }
 0x2a0   : > { %1811 = vmatpush3.xpose.msk.msra.mxu1 %vm592_vm2, %v669_v51  ;;  %1817 = vmatprep.mubr.msk.f32.mxu0 %vm2055_vm1, %v2056_v18 }
 0x2a1   : > { %1820 = vmatprep.subr.mxu1 %v2056_v18 }
 0x2a3   : > { %v746_v52 = vpop.permute.xlu0 %745  ;;  %1813 = vmatmul.mubr.msk.f32.vlgmr.msra.gmra.mrb[4].mxu1 %vm592_vm2, %v445_v43  ;;  %v823_v53 = vpop.permute.xlu1 %822 }
 0x2a4   : > { %1816 = vmatpush3.xpose.msk.msra.mxu0 %vm592_vm2, %v746_v52  ;;  %1821 = vmatpush3.xpose.msk.msra.mxu1 %vm592_vm2, %v823_v53 }
 0x2a5   : > { %1822 = vmatprep.mubr.msk.f32.mxu1 %vm2055_vm1, %v2056_v18  ;;  %1825 = vmatprep.subr.mxu0 %v2056_v18 }
 0x2a6   : > { %1830 = vmatprep.subr.mxu1 %v2056_v18 }
 0x2a7   : > { %1818 = vmatmul.mubr.msk.f32.vlgmr.msra.gmra.mrb[6].mxu0 %vm592_vm2, %v2225_v46  ;;  %1823 = vmatmul.mubr.msk.f32.vlgmr.msra.gmra.mrb[6].mxu1 %vm592_vm2, %v2227_v47 }
 0x2a8   : > { %1827 = vmatprep.mubr.msk.f32.mxu0 %vm2055_vm1, %v2056_v18  ;;  %1832 = vmatprep.mubr.msk.f32.mxu1 %vm2055_vm1, %v2056_v18 }
 0x372   : > { %v663_v54 = vpop.f32.mrb[4].mxu0 }
 0x373   : > { %v1809_v55 = vpop.f32.mrb[5].mxu0  ;;  %v898_v56 = vsel %vm592_vm2, %v663_v54, -inf }
 0x374   : > { %899 = vmax.xlane.f32.xlu1 %v898_v56 }
 0x376   : > { %v740_v57 = vpop.f32.mrb[4].mxu1 }
 0x377   : > { %v1814_v58 = vpop.f32.mrb[5].mxu1  ;;  %v901_v59 = vsel %vm592_vm2, %v740_v57, -inf }
 0x378   : > { %902 = vmax.xlane.f32.xlu0 %v901_v59 }
 0x37a   : > { %v817_v60 = vpop.f32.mrb[6].mxu0  ;;  %v894_v61 = vpop.f32.mrb[6].mxu1 }
 0x37b   : > { %v1819_v62 = vpop.f32.mrb[7].mxu0  ;;  %v1824_v63 = vpop.f32.mrb[7].mxu1  ;;  %v904_v0 = vsel %vm592_vm2, %v817_v60, -inf  ;;  %v907_v1 = vsel %vm592_vm2, %v894_v61, -inf }
 0x37c   : > { %905 = vmax.xlane.f32.xlu1 %v904_v0 }
 0x380   : > { %908 = vmax.xlane.f32.xlu1 %v907_v1 }
 0x38e   : > { %946 = vrot.lane.b32.xlu0 %v375_v42, %s2058_s26 }
 0x391   : > { %1022 = vrot.lane.b32.xlu1 %v445_v43, %s2058_s26 }
 0x401   : > { %v900_v2 = vpop.xlane.xlu1 %899 }
 0x402   : > { %v910_v3 = vsub.f32 %v663_v54, %v900_v2 }
 0x404   : > { %v914_v4 = vmul.f32 1.442695, %v910_v3 }
 0x405   : > { %v903_v5 = vpop.xlane.xlu0 %902 }
 0x406   : > { %1942 = vpow2.f32 %v914_v4  ;;  %v911_v6 = vsub.f32 %v740_v57, %v903_v5 }
 0x408   : > { %v916_v7 = vmul.f32 1.442695, %v911_v6 }
 0x409   : > { %v906_v8 = vpop.xlane.xlu1 %905  ;;  %v947_v9 = vpop.permute.xlu0 %946 }
 0x40a   : > { %1944 = vpow2.f32 %v916_v7  ;;  %v912_v10 = vsub.f32 %v817_v60, %v906_v8  ;;  %1826 = vmatpush3.msra.mxu0 %v947_v9 }
 0x40b   : > { %1835 = vmatprep.subr.mxu0 %v2056_v18 }
 0x40c   : > { %v918_v11 = vmul.f32 1.442695, %v912_v10 }
 0x40d   : > { %v909_v12 = vpop.xlane.xlu1 %908 }
 0x40e   : > { %1946 = vpow2.f32 %v918_v11  ;;  %v913_v13 = vsub.f32 %v894_v61, %v909_v12 }
 0x410   : > { %v1943_v14 = vpop.eup %1942  ;;  %v920_v15 = vmul.f32 1.442695, %v913_v13 }
 0x411   : > { %v1023_v16 = vpop.permute.xlu1 %1022  ;;  %v922_v17 = vsel %vm592_vm2, %v1943_v14, 0.0 }
 0x412   : > { %1948 = vpow2.f32 %v920_v15  ;;  %1831 = vmatpush3.msra.mxu1 %v1023_v16  ;;  %923 = vadd.xlane.f32.xlu1 %v922_v17 }
 0x413   : > { %1840 = vmatprep.subr.mxu1 %v2056_v18 }
 0x414   : > { %v1945_v19 = vpop.eup %1944 }
 0x415   : > { %v925_v20 = vsel %vm592_vm2, %v1945_v19, 0.0 }
 0x416   : > { %926 = vadd.xlane.f32.xlu1 %v925_v20 }
 0x418   : > { %v1947_v21 = vpop.eup %1946 }
 0x419   : > { %v928_v22 = vsel %vm592_vm2, %v1947_v21, 0.0 }
 0x41a   : > { %929 = vadd.xlane.f32.xlu0 %v928_v22 }
 0x41c   : > { %v1949_v23 = vpop.eup %1948 }
 0x41d   : > { %v931_v24 = vsel %vm592_vm2, %v1949_v23, 0.0 }
 0x41e   : > { %932 = vadd.xlane.f32.xlu1 %v931_v24 }
 0x42f   : > { %1098 = vrot.lane.b32.xlu1 %v2225_v46, %s2058_s26 }
 0x430   : > { %1174 = vrot.lane.b32.xlu0 %v2227_v47, %s2058_s26 }
 0x49f   : > { %v924_v25 = vpop.xlane.xlu1 %923 }
 0x4a0   : > { %1950 = vrcp.f32 %v924_v25 }
 0x4a3   : > { %v927_v26 = vpop.xlane.xlu1 %926 }
 0x4a4   : > { %1952 = vrcp.f32 %v927_v26 }
 0x4a7   : > { %v930_v27 = vpop.xlane.xlu0 %929 }
 0x4a8   : > { %1954 = vrcp.f32 %v930_v27 }
 0x4aa   : > { %v1951_v28 = vpop.eup %1950 }
 0x4ab   : > { %v938_v29 = vmul.f32 %v1951_v28, %v1943_v14  ;;  %v933_v30 = vpop.xlane.xlu1 %932  ;;  %v1175_v34 = vpop.permute.xlu0 %1174 }
 0x4ac   : > { %1956 = vrcp.f32 %v933_v30 }
 0x4ad   : > { %1828 = vmatmul.mubr.msk.f32.vlgmr.msra.gmra.mrb[8].mxu0 %vm592_vm2, %v938_v29  ;;  %942 = vst.msk [vmem:[%s2274_s9] sm:$0xff] %vm592_vm2, %v938_v29 }
 0x4ae   : > { %v1953_v31 = vpop.eup %1952  ;;  %1837 = vmatprep.mubr.msk.f32.mxu0 %vm2055_vm1, %v2056_v18 }
 0x4af   : > { %v939_v32 = vmul.f32 %v1953_v31, %v1945_v19  ;;  %v1099_v33 = vpop.permute.xlu1 %1098 }
 0x4b0   : > { %1836 = vmatpush3.msra.mxu0 %v1099_v33 }
 0x4b1   : > { %1833 = vmatmul.mubr.msk.f32.vlgmr.msra.gmra.mrb[8].mxu1 %vm592_vm2, %v939_v32  ;;  %1845 = vmatprep.subr.mxu0 %v2056_v18  ;;  %943 = vst.msk [vmem:[%s2274_s9 + $0x8] sm:$0xff] %vm592_vm2, %v939_v32 }
 0x4b2   : > { %v1955_v35 = vpop.eup %1954  ;;  %1841 = vmatpush3.msra.mxu1 %v1175_v34  ;;  %1842 = vmatprep.mubr.msk.f32.mxu1 %vm2055_vm1, %v2056_v18 }
 0x4b3   : > { %v940_v36 = vmul.f32 %v1955_v35, %v1947_v21  ;;  %1850 = vmatprep.subr.mxu1 %v2056_v18 }
 0x4b5   : > { %1838 = vmatmul.mubr.msk.f32.vlgmr.msra.gmra.mrb[10].mxu0 %vm592_vm2, %v940_v36  ;;  %944 = vst.msk [vmem:[%s2274_s9 + $0x10] sm:$0xff] %vm592_vm2, %v940_v36 }
 0x4b6   : > { %v1957_v37 = vpop.eup %1956  ;;  %1847 = vmatprep.mubr.msk.f32.mxu0 %vm2055_vm1, %v2056_v18  ;;  %1846 = vmatpush3.msra.mxu0 %v1250_v39 }
 0x4b7   : > { %v941_v38 = vmul.f32 %v1957_v37, %v1949_v23  ;;  %1855 = vmatprep.subr.mxu0 %v2056_v18 }
 0x4b9   : > { %1843 = vmatmul.mubr.msk.f32.vlgmr.msra.gmra.mrb[10].mxu1 %vm592_vm2, %v941_v38  ;;  %945 = vst.msk [vmem:[%s2274_s9 + $0x18] sm:$0xff] %vm592_vm2, %v941_v38  ;;  %s1964_s9 = scalar_lea.vmem %s1963_s13, 1024 }
 0x4ba   : > { %1852 = vmatprep.mubr.msk.f32.mxu1 %vm2055_vm1, %v2056_v18  ;;  %1851 = vmatpush3.msra.mxu1 %v1251_v40  ;;  %p1966_p1 = scmp.lt.s32.totalorder %s1964_s9, %s1958_s11 }
 0x4bb   : > { %1860 = vmatprep.subr.mxu1 %v2056_v18 }
 0x4bc   : > { %p1967_p2 = por %p1966_p1, %p1965_p0 }
 0x4be   : > { %p1968_p3 = pnand %p1967_p2, %p1961_p13 }
 0x580   : > { %v1018_v42 = vpop.f32.mrb[8].mxu0 }
 0x581   : > { %v1829_v43 = vpop.f32.mrb[9].mxu0  ;;  %1848 = vmatmul.mubr.msk.f32.vlgmr.msra.gmra.mrb[12].mxu0 %vm592_vm2, %v1018_v42 }
 0x582   : > { %1856 = vmatpush3.msra.mxu0 %v1252_v41  ;;  %1857 = vmatprep.mubr.msk.f32.mxu0 %vm2055_vm1, %v2056_v18 }
 0x584   : > { %v1094_v45 = vpop.f32.mrb[8].mxu1 }
 0x585   : > { %v1834_v46 = vpop.f32.mrb[9].mxu1  ;;  %1853 = vmatmul.mubr.msk.f32.vlgmr.msra.gmra.mrb[12].mxu1 %vm592_vm2, %v1094_v45 }
 0x586   : > { %1861 = vmatpush3.msra.mxu1 %v1253_v44  ;;  %1862 = vmatprep.mubr.msk.f32.mxu1 %vm2055_vm1, %v2056_v18 }
 0x588   : > { %v1170_v47 = vpop.f32.mrb[10].mxu0 }
 0x589   : > { %v1839_v48 = vpop.f32.mrb[11].mxu0  ;;  %1858 = vmatmul.mubr.msk.f32.vlgmr.msra.gmra.mrb[14].mxu0 %vm592_vm2, %v1170_v47 }
 0x58c   : > { %v1246_v49 = vpop.f32.mrb[10].mxu1 }
 0x58d   : > { %v1844_v50 = vpop.f32.mrb[11].mxu1  ;;  %1863 = vmatmul.mubr.msk.f32.vlgmr.msra.gmra.mrb[14].mxu1 %vm592_vm2, %v1246_v49 }
 0x58e   : > { %1971 = shalt.err (!%p1968_p3)
}
 0x58f   : > { %s1972_s14 = scalar_lea.hbm %s2326_s29, 512  ;;  %s1976_s17 = scalar_lea.hbm %s2411_s6, 1024 }
 0x590   : > { %p1973_p4 = scmp.ne.s32.totalorder %s2326_s29, %s1972_s14  ;;  %p1977_p9 = scmp.lt.u32.totalorder %s2326_s29, %s2411_s6 }
 0x591   : > { %p1978_p10 = scmp.lt.u32.totalorder %s1976_s17, %s1972_s14  ;;  %p1980_p12 = scmp.lt.u32.totalorder %s1972_s14, %s2326_s29 }
 0x592   : > { %p1974_p7 = pnand %p1973_p4, %p2136_p5 }
 0x593   : > { %p1979_p11 = por %p1978_p10, %p1977_p9 }
 0x594   : > { %p1975_p8 = pneg %p1974_p7 }
 0x595   : > { %p1981_p13 = por %p1980_p12, %p1979_p11 }
 0x597   : > { %p1982_p0 = pnand %p1981_p13, %p1975_p8 }
 0x599   : > { %1985 = shalt.err (!%p1982_p0)
}
 0x59a   : > { %s2060_s26 = smov 128   ;;  %s2061_s11 = smov 8  }
 0x59b   : > { %1890 = dma.vmem_to_hbm [thread:$0]  (%p2136_p5), %s2321_s18, 512, %s2326_s29, %s1560_s10, %s2060_s26, %s2060_s26, %s2061_s11  }
 0x59c   : > { %s1684_s12 = sshll.u32 %s2270_s28, 3  ;;  %s1711_s13 = sshll.u32 %s2119_s25, 7 }
 0x59d   : > { %s246_s9 = scalar_lea.vmem [#allocation2], %s1684_s12  ;;  %s2361_s14 = scalar_lea.hbm %s2410_s5, %s1711_s13 }
 0x59e   : > { %s1573_s18 = sshll.u32 %s246_s9, 4  ;;  %s1555_s25 = scalar_lea.sflag [#allocation3], %s2270_s28  ;;  %s2363_s18 = int_to_ptr.vmem [resolvable:$true] %s1573_s18 }
 0x59f   : > { %s1986_s15 = scalar_lea.vmem %s2363_s18, 128  ;;  %s2062_s16 = smov [#allocation2]  }
 0x5a0   : > { %p1987_p1 = scmp.ne.s32.totalorder %s2363_s18, %s1986_s15  ;;  %s1990_s17 = sshll.u32 %s2062_s16, 4  ;;  %s1991_s17 = int_to_ptr.vmem [resolvable:$false] %s1990_s17 }
 0x5a1   : > { %s1992_s19 = scalar_lea.vmem %s1991_s17, 256  ;;  %p1993_p4 = scmp.lt.s32.totalorder %s2363_s18, %s1991_s17 }
 0x5a2   : > { %p1988_p2 = pnand %p1987_p1, %p2136_p5  ;;  %p1994_p7 = scmp.lt.s32.totalorder %s1992_s19, %s1986_s15 }
 0x5a4   : > { %p1989_p3 = pneg %p1988_p2  ;;  %p1995_p8 = por %p1994_p7, %p1993_p4 }
 0x5a6   : > { %p1996_p9 = pnand %p1995_p8, %p1989_p3 }
 0x654   : > { %v1323_v18 = vpop.f32.mrb[12].mxu0 }
 0x655   : > { %v1849_v51 = vpop.f32.mrb[13].mxu0  ;;  %v1546_v53 = vsel %vm259_vm0, %v1323_v18, 0.0 }
 0x658   : > { %v1396_v52 = vpop.f32.mrb[12].mxu1 }
 0x659   : > { %v1547_v54 = vsel %vm259_vm0, %v1396_v52, 0.0  ;;  %v1854_v55 = vpop.f32.mrb[13].mxu1 }
 0x65a   : > { %v1548_v56 = vadd.f32 %v1547_v54, %v1546_v53 }
 0x65c   : > { %v1469_v57 = vpop.f32.mrb[14].mxu0 }
 0x65d   : > { %v1549_v58 = vsel %vm259_vm0, %v1469_v57, 0.0  ;;  %v1859_v59 = vpop.f32.mrb[15].mxu0 }
 0x65e   : > { %v1550_v60 = vadd.f32 %v1549_v58, %v1548_v56 }
 0x660   : > { %v1542_v61 = vpop.f32.mrb[14].mxu1 }
 0x661   : > { %v1551_v62 = vsel %vm259_vm0, %v1542_v61, 0.0  ;;  %v1864_v63 = vpop.f32.mrb[15].mxu1 }
 0x662   : > { %v1552_v0 = vadd.f32 %v1551_v62, %v1550_v60 }
 0x664   : > { %1553 = vst.msk [vmem:[%s246_s9] sm:$0xff] %vm259_vm0, %v1552_v0 }
 0x665   : > { %1999 = shalt.err (!%p1996_p9)
}
 0x666   : > { %s2000_s28 = scalar_lea.hbm %s2361_s14, 128  ;;  %s2004_s11 = scalar_lea.hbm %s2410_s5, 256 }
 0x667   : > { %p2001_p10 = scmp.ne.s32.totalorder %s2361_s14, %s2000_s28  ;;  %p2005_p13 = scmp.lt.u32.totalorder %s2361_s14, %s2410_s5 }
 0x668   : > { %p2006_p0 = scmp.lt.u32.totalorder %s2004_s11, %s2000_s28  ;;  %p2008_p2 = scmp.lt.u32.totalorder %s2000_s28, %s2361_s14 }
 0x669   : > { %p2002_p11 = pnand %p2001_p10, %p2136_p5 }
 0x66a   : > { %p2007_p1 = por %p2006_p0, %p2005_p13 }
 0x66b   : > { %p2003_p12 = pneg %p2002_p11 }
 0x66c   : > { %p2009_p3 = por %p2008_p2, %p2007_p1 }
 0x66e   : > { %p2010_p4 = pnand %p2009_p3, %p2003_p12 }
 0x670   : > { %2013 = shalt.err (!%p2010_p4)
}
 0x671   : > { %1889 = dma.vmem_to_hbm [thread:$0]  (%p2136_p5), %s2363_s18, 128, %s2361_s14, %s1555_s25  }
 0x672 PF: > { %p1900_p7 = scmp.ge.s32.totalorder %s2052_s24, 2  ;;  %s1601_s9 = sand.u32 1, %s2040_s21  }
 0x673   : > { %s1602_s29 = scalar_lea.sflag [#allocation3], %s1601_s9 }
 0x674   : > { %p1894_p8 = pnand %p1900_p7, %p2140_p6 }
 0x676   : > { %2031 = dma.done.wait (!%p1894_p8), %s1602_s29, 128  }
 0x677   : > { %2033 = vsyncadd (!%p1894_p8), %s1602_s29, 4294967168  ;;  %s1611_s10 = scalar_lea.sflag [#allocation5], %s1601_s9 }
 0x678   : > { %2035 = dma.done.wait (!%p1894_p8), %s1611_s10, 512  }
 0x679   : > { %2037 = vsyncadd (!%p1894_p8), %s1611_s10, 4294966784  ;;  %p20_p5 = scmp.ge.s32.totalorder %s2123_s27, 4   ;;  %s2414_s21 = smov %s2044_s22 }
 0x67a   : > { %s2415_s22 = smov %s2048_s23  ;;  %s2416_s23 = smov %s2134_s30 }
 0x67b   : > { %s2417_s24 = smov %s2123_s27  ;;  %22 = sbr.rel (!%p20_p5) target bundleno = 5 (0x5), region = 92 }
 0x682   :  { %1616 = vsyncpa [#allocation3], 1 }
 0x683   :  { %1618 = vsyncpa [#allocation3 + $0x1], 1 }
 0x684   :  { %1619 = vsyncpa [#allocation5], 1 }
 0x685   :  { %1621 = vsyncpa [#allocation5 + $0x1], 1 }

</bundles_post_ra>
